<compile_context>
chip_gen: v7x
topology: tpu7x:2x2x1
jax: 0.10.0
libtpu: 0.0.40
codegen_flags: <defaults>
</compile_context>

<pallas_src>
import math
from functools import partial

import jax
import jax.numpy as jnp
from jax.experimental import pallas as pl
from jax.experimental.pallas import tpu as pltpu

EPS = 1e-5


# ---------------------------------------------------------------------------
# Fused kernel: modulation expansion + both norm branches + both linear layers
#   adaT : [S, B]            adaLN output, transposed (S = C1 + 2*C0)
#   bids : [1, Np]  int32    graph id per node
#   x2   : [L*M*C1, Np]      equivariant features, rows ordered (l, m, c), nodes in lanes
#   x0   : [C0, Np]          scalar features, nodes in lanes
#   wbig : [L*M*D1, L*M*C1]  kron(I_{L*M}, W_l^T), block-diagonal over (l, m)
#   w0T  : [D0, C0], b0 : [D0, 1]
#   out  : [L*M*D1, Np], out0 : [D0, Np]
# ---------------------------------------------------------------------------
def _fused_kernel(adaT_ref, bid_ref, x_ref, x0_ref, wbig_ref, w0t_ref, b0_ref,
                  out_ref, out0_ref, *, L, M, C1, C0):
    tn = x_ref.shape[-1]
    S, B = adaT_ref.shape

    adaT = adaT_ref[...].astype(jnp.float32)            # [S, B]
    bids = bid_ref[...]                                  # [1, tn] int32

    # --- per-graph -> per-node modulation (exact f32 select-accumulate; B small/static)
    mod = jnp.zeros((S, tn), jnp.float32)
    for b in range(B):
        sel = jnp.where(bids == b, 1.0, 0.0)              # [1, tn]
        mod = mod + adaT[:, b:b + 1] * sel                # [S, tn]
    scale = mod[:C1]                                      # [C1, tn]
    scale0 = mod[C1:C1 + C0]                              # [C0, tn]
    shift0 = mod[C1 + C0:C1 + 2 * C0]                     # [C0, tn]

    # --- equivariant branch: RMS norm per (node, degree) + (1+scale) + channel mix ----
    x2 = x_ref[...].astype(jnp.float32)                   # [L*M*C1, tn]
    scale_b = jnp.concatenate([1.0 + scale] * M, axis=0)  # [M*C1, tn]
    rows = M * C1
    y_parts = []
    for l in range(L):                                    # L is tiny & static
        xl = x2[l * rows:(l + 1) * rows]                  # [M*C1, tn] (8-aligned slice)
        sq = jnp.sum(xl * xl, axis=0, keepdims=True)      # [1, tn]
        yl = xl * jax.lax.rsqrt(sq / C1 + EPS)
        y_parts.append(yl * scale_b)
    y2 = jnp.concatenate(y_parts, axis=0)                 # [L*M*C1, tn]
    # Single MXU matmul covers every (l, m) at once (lane-dense [L*M*D1, tn] result).
    # Optional v6e/v7x micro-opt: cast operands to bf16 here; kept f32 for exactness.
    out_ref[...] = jnp.dot(wbig_ref[...], y2,
                           preferred_element_type=jnp.float32).astype(out_ref.dtype)

    # --- scalar branch: LayerNorm + (1+scale0)*y + shift0 + Linear ---------------------
    x0 = x0_ref[...].astype(jnp.float32)                   # [C0, tn]
    mu = jnp.mean(x0, axis=0, keepdims=True)
    var = jnp.mean((x0 - mu) * (x0 - mu), axis=0, keepdims=True)
    y0 = (x0 - mu) * jax.lax.rsqrt(var + EPS)
    y0 = y0 * (1.0 + scale0) + shift0
    out0_ref[...] = (jnp.dot(w0t_ref[...], y0, preferred_element_type=jnp.float32)
                     + b0_ref[...]).astype(out0_ref.dtype)


def _fused_call(adaT, bids, x_k, x0_k, w_big, w0T, b0c, L, M, C1, C0, tn):
    S, B = adaT.shape
    RK, Np = x_k.shape           # RK = L*M*C1
    RD = w_big.shape[0]          # RD = L*M*D1
    D0 = w0T.shape[0]
    return pl.pallas_call(
        partial(_fused_kernel, L=L, M=M, C1=C1, C0=C0),
        out_shape=(jax.ShapeDtypeStruct((RD, Np), jnp.float32),
                   jax.ShapeDtypeStruct((D0, Np), jnp.float32)),
        grid=(Np // tn,),
        in_specs=[
            pl.BlockSpec((S, B), lambda n: (0, 0)),
            pl.BlockSpec((1, tn), lambda n: (0, n)),
            pl.BlockSpec((RK, tn), lambda n: (0, n)),
            pl.BlockSpec((C0, tn), lambda n: (0, n)),
            pl.BlockSpec((RD, RK), lambda n: (0, 0)),
            pl.BlockSpec((D0, C0), lambda n: (0, 0)),
            pl.BlockSpec((D0, 1), lambda n: (0, 0)),
        ],
        out_specs=(pl.BlockSpec((RD, tn), lambda n: (0, n)),
                   pl.BlockSpec((D0, tn), lambda n: (0, n))),
        compiler_params=pltpu.CompilerParams(
            dimension_semantics=("parallel",)),
    )(adaT, bids, x_k, x0_k, w_big, w0T, b0c)


def _node_tiling(n, max_tile=2048):
    """Pad node count to a multiple of 128 and pick the largest dividing tile."""
    np_pad = ((n + 127) // 128) * 128
    for cand in (2048, 1024, 512, 256, 128):
        if cand <= max_tile and np_pad % cand == 0:
            return np_pad, cand
    return np_pad, 128


# ---------------------------------------------------------------------------
# Parameter init (deterministic, shapes from the module __init__)
# ---------------------------------------------------------------------------
def init_last_layer_params(key, emb_channel, output_channel_list, L):
    C1, C0 = emb_channel
    D1, D0 = output_channel_list
    Dt = C1 + C0 * L                           # adaLN input dim
    S = C1 + 2 * C0                            # adaLN output dim (size1 + 2*size0)
    k = jax.random.split(key, 5)
    lim_a = 1.0 / math.sqrt(Dt)
    w_ada = jax.random.uniform(k[0], (Dt, S), jnp.float32, -lim_a, lim_a)
    b_ada = jax.random.uniform(k[1], (1, S), jnp.float32, -lim_a, lim_a)
    # Linear_p.weights: PyTorch shape [C1, D1, L]; stored degree-major [L, C1, D1]
    lim_w = 1.0 / math.sqrt(C1)
    w_t = jax.random.uniform(k[2], (L, C1, D1), jnp.float32, -lim_w, lim_w)
    # Linear_p.linear_0: nn.Linear(C0, D0) stored as [C0, D0]
    lim0 = 1.0 / math.sqrt(C0)
    w0 = jax.random.uniform(k[3], (C0, D0), jnp.float32, -lim0, lim0)
    b0 = jax.random.uniform(k[4], (1, D0), jnp.float32, -lim0, lim0)
    return dict(w_ada=w_ada, b_ada=b_ada, w_t=w_t, w0=w0, b0=b0)


# ---------------------------------------------------------------------------
# LastLayer.forward
# ---------------------------------------------------------------------------
def last_layer_forward(params, x, x_0, batch, piece, t_code, emb_channel, L):
    # TODO(synk): reference LayerNorm/get_size/modulate classes were not provided; `piece`
    # (and any graph-wise statistics keyed by `batch`) is unused by this per-node norm.
    C1, C0 = emb_channel
    N, _, _, M = x.shape
    D1 = params["w_t"].shape[-1]

    # adaLN head: tiny matmul — leave to XLA (a pallas_call launch would cost more).
    s = t_code * jax.nn.sigmoid(t_code)
    ada = s @ params["w_ada"] + params["b_ada"]               # [B, S]
    adaT = ada.T                                              # [S, B]

    # Node-last, lane-dense kernel layout; pad node axis to the tile.
    Np, tn = _node_tiling(N)
    pad = Np - N
    x_k = jnp.transpose(x, (2, 3, 1, 0)).reshape(L * M * C1, N)      # rows = (l, m, c)
    x_k = jnp.pad(x_k, ((0, 0), (0, pad)))                            # [L*M*C1, Np]
    x0_k = jnp.pad(x_0.T, ((0, 0), (0, pad)))                         # [C0, Np]
    bids = jnp.pad(batch.astype(jnp.int32)[None, :], ((0, 0), (0, pad)))  # [1, Np]

    # Block-diagonal weight kron(I_{L*M}, W_l^T): one MXU matmul covers every (l, m).
    wT = jnp.transpose(params["w_t"], (0, 2, 1))                      # [L, D1, C1]
    w_lm = jnp.broadcast_to(wT[:, None], (L, M, D1, C1)).reshape(L * M, D1, C1)
    eye = jnp.eye(L * M, dtype=wT.dtype)
    w_big = jnp.einsum('pq,pdc->pdqc', eye, w_lm).reshape(L * M * D1, L * M * C1)

    w0T = params["w0"].T                                              # [D0, C0]
    b0c = params["b0"].T                                              # [D0, 1]

    out_flat, out0_flat = _fused_call(adaT, bids, x_k, x0_k, w_big, w0T, b0c,
                                      L, M, C1, C0, tn)

    # Back to the PyTorch layouts [N, D1, L, M] / [N, D0].
    out = jnp.transpose(out_flat.reshape(L, M, D1, Np)[:, :, :, :N], (3, 2, 0, 1))
    out_0 = out0_flat[:, :N].T
    return out, out_0


# ---------------------------------------------------------------------------
# Pure-JAX reference (same semantics) for a correctness check
# ---------------------------------------------------------------------------
def ref_forward(params, x, x_0, batch, t_code, emb_channel, L):
    C1, C0 = emb_channel
    s = t_code * jax.nn.sigmoid(t_code)
    ada = s @ params["w_ada"] + params["b_ada"]
    scale, scale_0, shift_0 = ada[:, :C1], ada[:, C1:C1 + C0], ada[:, C1 + C0:]
    # equivariant RMS norm per (node, degree)
    sq = jnp.sum(x ** 2, axis=3)                                       # [N, C1, L]
    denom = jax.lax.rsqrt(jnp.mean(sq, axis=1, keepdims=True) + EPS)   # [N, 1, L]
    y = x * denom[:, :, :, None]
    y = y * (1.0 + scale[batch])[:, :, None, None]
    w_pt = jnp.transpose(params["w_t"], (1, 2, 0))                     # [C1, D1, L]
    out = jnp.einsum('cdl,nclm->ndlm', w_pt, y)
    # scalar LayerNorm branch
    mu = jnp.mean(x_0, axis=-1, keepdims=True)
    var = jnp.mean((x_0 - mu) ** 2, axis=-1, keepdims=True)
    y0 = (x_0 - mu) * jax.lax.rsqrt(var + EPS)
    y0 = y0 * (1.0 + scale_0[batch]) + shift_0[batch]
    out_0 = y0 @ params["w0"] + params["b0"]
    return out, out_0


if __name__ == "__main__":
    key = jax.random.PRNGKey(0)
    emb_channel = [16, 8]          # [C1 (equivariant channels), C0 (scalar channels)]
    output_channel_list = [8, 4]   # [D1, D0]
    L = 2                          # number of degrees
    M = 3                          # components per degree (the `m` axis)
    N = 24                         # nodes
    B = 2                          # graphs in the batch

    kp, kx, kx0, kb, kt = jax.random.split(key, 5)
    params = init_last_layer_params(kp, emb_channel, output_channel_list, L)

    x = jax.random.normal(kx, (N, emb_channel[0], L, M), jnp.float32)
    x_0 = jax.random.normal(kx0, (N, emb_channel[1]), jnp.float32)
    batch = jax.random.randint(kb, (N,), 0, B)
    piece = jnp.zeros((N,), jnp.int32)
    t_code = jax.random.normal(kt, (B, emb_channel[0] + emb_channel[1] * L), jnp.float32)

    out, out_0 = last_layer_forward(params, x, x_0, batch, piece, t_code, emb_channel, L)
    jax.block_until_ready((out, out_0))

    ref, ref_0 = ref_forward(params, x, x_0, batch, t_code, emb_channel, L)
    assert out.shape == (N, output_channel_list[0], L, M)
    assert out_0.shape == (N, output_channel_list[1])
    # Tolerance reflects default MXU matmul precision (bf16 operand passes) used by both
    # the Pallas kernel and the XLA reference einsum.
    assert jnp.allclose(out, ref, rtol=1e-2, atol=1e-2)
    assert jnp.allclose(out_0, ref_0, rtol=1e-2, atol=1e-2)
    print("KERNEL_OK")
</pallas_src>

<mosaic_0001>
module attributes {stable_mosaic.version = 11 : i64} {
  func.func @_fused_kernel(%arg0: i32, %arg1: memref<32x2xf32, #tpu.memory_space<vmem>>, %arg2: memref<1x128xi32, #tpu.memory_space<vmem>>, %arg3: memref<96x128xf32, #tpu.memory_space<vmem>>, %arg4: memref<8x128xf32, #tpu.memory_space<vmem>>, %arg5: memref<48x96xf32, #tpu.memory_space<vmem>>, %arg6: memref<4x8xf32, #tpu.memory_space<vmem>>, %arg7: memref<4x1xf32, #tpu.memory_space<vmem>>, %arg8: memref<48x128xf32, #tpu.memory_space<vmem>>, %arg9: memref<4x128xf32, #tpu.memory_space<vmem>>) attributes {dimension_semantics = [#tpu.dimension_semantics<parallel>], iteration_bounds = array<i64: 1>, scalar_prefetch = 0 : i64, scratch_operands = 0 : i64, tpu.core_type = #tpu.core_type<tc>, window_params = [{pipeline_mode = #tpu.pipeline_mode<synchronous>, transform_indices = @transform_0, window_bounds = array<i64: 32, 2>}, {transform_indices = @transform_1, window_bounds = array<i64: 1, 128>}, {transform_indices = @transform_2, window_bounds = array<i64: 96, 128>}, {transform_indices = @transform_3, window_bounds = array<i64: 8, 128>}, {pipeline_mode = #tpu.pipeline_mode<synchronous>, transform_indices = @transform_4, window_bounds = array<i64: 48, 96>}, {pipeline_mode = #tpu.pipeline_mode<synchronous>, transform_indices = @transform_5, window_bounds = array<i64: 4, 8>}, {pipeline_mode = #tpu.pipeline_mode<synchronous>, transform_indices = @transform_6, window_bounds = array<i64: 4, 1>}, {transform_indices = @transform_7, window_bounds = array<i64: 48, 128>}, {transform_indices = @transform_8, window_bounds = array<i64: 4, 128>}]} {
    %c0 = arith.constant 0 : index
    %c0_0 = arith.constant 0 : index
    %0 = vector.load %arg1[%c0, %c0_0] : memref<32x2xf32, #tpu.memory_space<vmem>>, vector<32x2xf32>
    %c0_1 = arith.constant 0 : index
    %c0_2 = arith.constant 0 : index
    %1 = vector.load %arg2[%c0_1, %c0_2] : memref<1x128xi32, #tpu.memory_space<vmem>>, vector<1x128xi32>
    %cst = arith.constant 0.000000e+00 : f32
    %2 = vector.broadcast %cst : f32 to vector<32x128xf32>
    %c0_i32 = arith.constant 0 : i32
    %3 = vector.broadcast %c0_i32 : i32 to vector<1x128xi32>
    %4 = arith.cmpi eq, %1, %3 : vector<1x128xi32>
    %cst_3 = arith.constant 1.000000e+00 : f32
    %cst_4 = arith.constant 0.000000e+00 : f32
    %5 = vector.broadcast %cst_3 : f32 to vector<1x128xf32>
    %6 = vector.broadcast %cst_4 : f32 to vector<1x128xf32>
    %7 = arith.select %4, %5, %6 : vector<1x128xi1>, vector<1x128xf32>
    %8 = vector.extract_strided_slice %0 {offsets = [0, 0], sizes = [32, 1], strides = [1, 1]} : vector<32x2xf32> to vector<32x1xf32>
    %9 = vector.broadcast %8 : vector<32x1xf32> to vector<32x128xf32>
    %10 = vector.broadcast %7 : vector<1x128xf32> to vector<32x128xf32>
    %11 = arith.mulf %9, %10 : vector<32x128xf32>
    %12 = arith.addf %2, %11 : vector<32x128xf32>
    %c1_i32 = arith.constant 1 : i32
    %13 = vector.broadcast %c1_i32 : i32 to vector<1x128xi32>
    %14 = arith.cmpi eq, %1, %13 : vector<1x128xi32>
    %cst_5 = arith.constant 1.000000e+00 : f32
    %cst_6 = arith.constant 0.000000e+00 : f32
    %15 = vector.broadcast %cst_5 : f32 to vector<1x128xf32>
    %16 = vector.broadcast %cst_6 : f32 to vector<1x128xf32>
    %17 = arith.select %14, %15, %16 : vector<1x128xi1>, vector<1x128xf32>
    %18 = vector.extract_strided_slice %0 {offsets = [0, 1], sizes = [32, 1], strides = [1, 1]} : vector<32x2xf32> to vector<32x1xf32>
    %19 = vector.broadcast %18 : vector<32x1xf32> to vector<32x128xf32>
    %20 = vector.broadcast %17 : vector<1x128xf32> to vector<32x128xf32>
    %21 = arith.mulf %19, %20 : vector<32x128xf32>
    %22 = arith.addf %12, %21 : vector<32x128xf32>
    %23 = vector.extract_strided_slice %22 {offsets = [0, 0], sizes = [16, 128], strides = [1, 1]} : vector<32x128xf32> to vector<16x128xf32>
    %24 = vector.extract_strided_slice %22 {offsets = [16, 0], sizes = [8, 128], strides = [1, 1]} : vector<32x128xf32> to vector<8x128xf32>
    %25 = vector.extract_strided_slice %22 {offsets = [24, 0], sizes = [8, 128], strides = [1, 1]} : vector<32x128xf32> to vector<8x128xf32>
    %c0_7 = arith.constant 0 : index
    %c0_8 = arith.constant 0 : index
    %26 = vector.load %arg3[%c0_7, %c0_8] : memref<96x128xf32, #tpu.memory_space<vmem>>, vector<96x128xf32>
    %cst_9 = arith.constant 1.000000e+00 : f32
    %27 = vector.broadcast %cst_9 : f32 to vector<16x128xf32>
    %28 = arith.addf %27, %23 : vector<16x128xf32>
    %29 = tpu.concatenate %28, %28, %28 in 0 : vector<16x128xf32>, vector<16x128xf32>, vector<16x128xf32> -> vector<48x128xf32>
    %30 = vector.extract_strided_slice %26 {offsets = [0, 0], sizes = [48, 128], strides = [1, 1]} : vector<96x128xf32> to vector<48x128xf32>
    %31 = arith.mulf %30, %30 : vector<48x128xf32>
    %cst_10 = arith.constant dense<0.000000e+00> : vector<128xf32>
    %32 = vector.multi_reduction <add>, %31, %cst_10 [0] : vector<48x128xf32> to vector<128xf32>
    %33 = vector.shape_cast %32 : vector<128xf32> to vector<1x128xf32>
    %cst_11 = arith.constant 1.600000e+01 : f32
    %34 = vector.broadcast %cst_11 : f32 to vector<1x128xf32>
    %35 = arith.divf %33, %34 : vector<1x128xf32>
    %cst_12 = arith.constant 9.99999974E-6 : f32
    %36 = vector.broadcast %cst_12 : f32 to vector<1x128xf32>
    %37 = arith.addf %35, %36 : vector<1x128xf32>
    %38 = math.rsqrt %37 : vector<1x128xf32>
    %39 = vector.broadcast %38 : vector<1x128xf32> to vector<48x128xf32>
    %40 = arith.mulf %30, %39 : vector<48x128xf32>
    %41 = arith.mulf %40, %29 : vector<48x128xf32>
    %42 = vector.extract_strided_slice %26 {offsets = [48, 0], sizes = [48, 128], strides = [1, 1]} : vector<96x128xf32> to vector<48x128xf32>
    %43 = arith.mulf %42, %42 : vector<48x128xf32>
    %cst_13 = arith.constant dense<0.000000e+00> : vector<128xf32>
    %44 = vector.multi_reduction <add>, %43, %cst_13 [0] : vector<48x128xf32> to vector<128xf32>
    %45 = vector.shape_cast %44 : vector<128xf32> to vector<1x128xf32>
    %cst_14 = arith.constant 1.600000e+01 : f32
    %46 = vector.broadcast %cst_14 : f32 to vector<1x128xf32>
    %47 = arith.divf %45, %46 : vector<1x128xf32>
    %cst_15 = arith.constant 9.99999974E-6 : f32
    %48 = vector.broadcast %cst_15 : f32 to vector<1x128xf32>
    %49 = arith.addf %47, %48 : vector<1x128xf32>
    %50 = math.rsqrt %49 : vector<1x128xf32>
    %51 = vector.broadcast %50 : vector<1x128xf32> to vector<48x128xf32>
    %52 = arith.mulf %42, %51 : vector<48x128xf32>
    %53 = arith.mulf %52, %29 : vector<48x128xf32>
    %54 = tpu.concatenate %41, %53 in 0 : vector<48x128xf32>, vector<48x128xf32> -> vector<96x128xf32>
    %c0_16 = arith.constant 0 : index
    %c0_17 = arith.constant 0 : index
    %55 = vector.load %arg5[%c0_16, %c0_17] : memref<48x96xf32, #tpu.memory_space<vmem>>, vector<48x96xf32>
    %cst_18 = arith.constant dense<0.000000e+00> : vector<48x128xf32>
    %56 = tpu.matmul %55, %54, %cst_18 {dimension_numbers = #tpu.dot_dimension_numbers<[1], [0], [0], [1], [0, 0, 1, 1], [], []>} : vector<48x96xf32>, vector<96x128xf32>, vector<48x128xf32> -> vector<48x128xf32>
    %c0_19 = arith.constant 0 : index
    %c0_20 = arith.constant 0 : index
    %57 = vector.load %arg8[%c0_19, %c0_20] : memref<48x128xf32, #tpu.memory_space<vmem>>, vector<48x128xf32>
    tpu.vector_store %arg8[%c0_19, %c0_20], %56 {strides = array<i32>} : memref<48x128xf32, #tpu.memory_space<vmem>>, vector<48x128xf32>,
    %c0_21 = arith.constant 0 : index
    %c0_22 = arith.constant 0 : index
    %58 = vector.load %arg4[%c0_21, %c0_22] : memref<8x128xf32, #tpu.memory_space<vmem>>, vector<8x128xf32>
    %cst_23 = arith.constant dense<0.000000e+00> : vector<128xf32>
    %59 = vector.multi_reduction <add>, %58, %cst_23 [0] : vector<8x128xf32> to vector<128xf32>
    %60 = vector.shape_cast %59 : vector<128xf32> to vector<1x128xf32>
    %cst_24 = arith.constant 8.000000e+00 : f32
    %61 = vector.broadcast %cst_24 : f32 to vector<1x128xf32>
    %62 = arith.divf %60, %61 : vector<1x128xf32>
    %63 = vector.broadcast %62 : vector<1x128xf32> to vector<8x128xf32>
    %64 = arith.subf %58, %63 : vector<8x128xf32>
    %65 = vector.broadcast %62 : vector<1x128xf32> to vector<8x128xf32>
    %66 = arith.subf %58, %65 : vector<8x128xf32>
    %67 = arith.mulf %64, %66 : vector<8x128xf32>
    %cst_25 = arith.constant dense<0.000000e+00> : vector<128xf32>
    %68 = vector.multi_reduction <add>, %67, %cst_25 [0] : vector<8x128xf32> to vector<128xf32>
    %69 = vector.shape_cast %68 : vector<128xf32> to vector<1x128xf32>
    %cst_26 = arith.constant 8.000000e+00 : f32
    %70 = vector.broadcast %cst_26 : f32 to vector<1x128xf32>
    %71 = arith.divf %69, %70 : vector<1x128xf32>
    %72 = vector.broadcast %62 : vector<1x128xf32> to vector<8x128xf32>
    %73 = arith.subf %58, %72 : vector<8x128xf32>
    %cst_27 = arith.constant 9.99999974E-6 : f32
    %74 = vector.broadcast %cst_27 : f32 to vector<1x128xf32>
    %75 = arith.addf %71, %74 : vector<1x128xf32>
    %76 = math.rsqrt %75 : vector<1x128xf32>
    %77 = vector.broadcast %76 : vector<1x128xf32> to vector<8x128xf32>
    %78 = arith.mulf %73, %77 : vector<8x128xf32>
    %cst_28 = arith.constant 1.000000e+00 : f32
    %79 = vector.broadcast %cst_28 : f32 to vector<8x128xf32>
    %80 = arith.addf %79, %24 : vector<8x128xf32>
    %81 = arith.mulf %78, %80 : vector<8x128xf32>
    %82 = arith.addf %81, %25 : vector<8x128xf32>
    %c0_29 = arith.constant 0 : index
    %c0_30 = arith.constant 0 : index
    %83 = vector.load %arg6[%c0_29, %c0_30] : memref<4x8xf32, #tpu.memory_space<vmem>>, vector<4x8xf32>
    %cst_31 = arith.constant dense<0.000000e+00> : vector<4x128xf32>
    %84 = tpu.matmul %83, %82, %cst_31 {dimension_numbers = #tpu.dot_dimension_numbers<[1], [0], [0], [1], [0, 0, 1, 1], [], []>} : vector<4x8xf32>, vector<8x128xf32>, vector<4x128xf32> -> vector<4x128xf32>
    %c0_32 = arith.constant 0 : index
    %c0_33 = arith.constant 0 : index
    %85 = vector.load %arg7[%c0_32, %c0_33] : memref<4x1xf32, #tpu.memory_space<vmem>>, vector<4x1xf32>
    %86 = vector.broadcast %85 : vector<4x1xf32> to vector<4x128xf32>
    %87 = arith.addf %84, %86 : vector<4x128xf32>
    %c0_34 = arith.constant 0 : index
    %c0_35 = arith.constant 0 : index
    %88 = vector.load %arg9[%c0_34, %c0_35] : memref<4x128xf32, #tpu.memory_space<vmem>>, vector<4x128xf32>
    tpu.vector_store %arg9[%c0_34, %c0_35], %87 {strides = array<i32>} : memref<4x128xf32, #tpu.memory_space<vmem>>, vector<4x128xf32>,
    return
  }
  func.func @transform_0(%arg0: i32) -> (i32, i32) {
    %c0_i32 = arith.constant 0 : i32
    %c0_i32_0 = arith.constant 0 : i32
    %c0_i32_1 = arith.constant 0 : i32
    return %c0_i32, %c0_i32_0 : i32, i32
  }
  func.func @transform_1(%arg0: i32) -> (i32, i32) {
    %c0_i32 = arith.constant 0 : i32
    %c0_i32_0 = arith.constant 0 : i32
    return %c0_i32, %arg0 : i32, i32
  }
  func.func @transform_2(%arg0: i32) -> (i32, i32) {
    %c0_i32 = arith.constant 0 : i32
    %c0_i32_0 = arith.constant 0 : i32
    return %c0_i32, %arg0 : i32, i32
  }
  func.func @transform_3(%arg0: i32) -> (i32, i32) {
    %c0_i32 = arith.constant 0 : i32
    %c0_i32_0 = arith.constant 0 : i32
    return %c0_i32, %arg0 : i32, i32
  }
  func.func @transform_4(%arg0: i32) -> (i32, i32) {
    %c0_i32 = arith.constant 0 : i32
    %c0_i32_0 = arith.constant 0 : i32
    %c0_i32_1 = arith.constant 0 : i32
    return %c0_i32, %c0_i32_0 : i32, i32
  }
  func.func @transform_5(%arg0: i32) -> (i32, i32) {
    %c0_i32 = arith.constant 0 : i32
    %c0_i32_0 = arith.constant 0 : i32
    %c0_i32_1 = arith.constant 0 : i32
    return %c0_i32, %c0_i32_0 : i32, i32
  }
  func.func @transform_6(%arg0: i32) -> (i32, i32) {
    %c0_i32 = arith.constant 0 : i32
    %c0_i32_0 = arith.constant 0 : i32
    %c0_i32_1 = arith.constant 0 : i32
    return %c0_i32, %c0_i32_0 : i32, i32
  }
  func.func @transform_7(%arg0: i32) -> (i32, i32) {
    %c0_i32 = arith.constant 0 : i32
    %c0_i32_0 = arith.constant 0 : i32
    return %c0_i32, %arg0 : i32, i32
  }
  func.func @transform_8(%arg0: i32) -> (i32, i32) {
    %c0_i32 = arith.constant 0 : i32
    %c0_i32_0 = arith.constant 0 : i32
    return %c0_i32, %arg0 : i32, i32
  }
}

</mosaic_0001>

<bundles_post_ra>
// kernel: tpu_custom_call.1
= control target key start
LH: loop header
LB: loop body
LE: loop exit
PB: predicated region body
PF: predicated region fallthrough
CT: control target
= control target key end

     0   :  { %14 = vsyncpa [#allocation3], 0  ;;  %s922_s0 = inlined_call_operand.vmem [shape: f32[32,2], index: 0, kind: input, shape index: {}]   ;;  %s923_s1 = inlined_call_operand.vmem [shape: s32[1,128], index: 1, kind: input, shape index: {}]   ;;  %s924_s2 = inlined_call_operand.hbm [shape: f32[96,128], index: 2, kind: input, shape index: {}]   ;;  %s925_s3 = inlined_call_operand.hbm [shape: f32[8,128], index: 3, kind: input, shape index: {}]   ;;  %s926_s4 = inlined_call_operand.vmem [shape: f32[48,96], index: 4, kind: input, shape index: {}]   ;;  %s927_s5 = inlined_call_operand.vmem [shape: f32[4,8], index: 5, kind: input, shape index: {}]   ;;  %s928_s6 = inlined_call_operand.vmem [shape: f32[4,1], index: 6, kind: input, shape index: {}]   ;;  %s929_s7 = inlined_call_operand.hbm [shape: f32[48,128], index: 7, kind: output, shape index: {0}]   ;;  %s930_s8 = inlined_call_operand.hbm [shape: f32[4,128], index: 8, kind: output, shape index: {1}]  }
   0x1   :  { %15 = vsyncpa [#allocation6], 0 }
   0x2   :  { %16 = vsyncpa [#allocation4], 0 }
   0x3   :  { %17 = vsyncpa [#allocation9], 0  ;;  %s687_s27 = smov [#allocation2]   ;;  %s591_s9 = scalar_lea.hbm %s924_s2, 1536 }
   0x4   :  { %s27_s28 = sshll.u32 %s687_s27, 4  ;;  %p592_p0 = scmp.ne.s32.totalorder %s924_s2, %s591_s9  ;;  %s28_s28 = int_to_ptr.vmem [resolvable:$true] %s27_s28 }
   0x5   :  { %p595_p1 = scmp.lt.u32.totalorder %s591_s9, %s924_s2 }
   0x7   :  { %p597_p2 = pnand %p595_p1, %p592_p0 }
   0x9   :  { %600 = shalt.err (!%p597_p2)
}
   0xa   :  { %s601_s14 = scalar_lea.vmem %s28_s28, 1536  ;;  %p606_p4 = scmp.lt.s32.totalorder %s28_s28, %s28_s28 }
   0xb   :  { %p602_p3 = scmp.ne.s32.totalorder %s28_s28, %s601_s14  ;;  %p607_p5 = scmp.lt.s32.totalorder %s601_s14, %s601_s14 }
   0xd   :  { %p608_p6 = por %p607_p5, %p606_p4 }
   0xf   :  { %p609_p7 = pnand %p608_p6, %p602_p3 }
  0x11   :  { %612 = shalt.err (!%p609_p7)
}
  0x12   :  { %s688_s15 = smov 128   ;;  %s689_s16 = smov 8  }
  0x13   :  { %33 = dma.hbm_to_vmem [thread:$0]  %s924_s2, 1536, %s28_s28, [#allocation3], %s688_s15, %s688_s15, %s689_s16  }
  0x14   :  { %s690_s19 = smov [#allocation5]   ;;  %s613_s23 = scalar_lea.hbm %s925_s3, 128 }
  0x15   :  { %s40_s20 = sshll.u32 %s690_s19, 4  ;;  %p614_p8 = scmp.ne.s32.totalorder %s925_s3, %s613_s23  ;;  %s41_s20 = int_to_ptr.vmem [resolvable:$true] %s40_s20 }
  0x16   :  { %p617_p9 = scmp.lt.u32.totalorder %s613_s23, %s925_s3 }
  0x18   :  { %p619_p10 = pnand %p617_p9, %p614_p8 }
  0x1a   :  { %622 = shalt.err (!%p619_p10)
}
  0x1b   :  { %s623_s29 = scalar_lea.vmem %s41_s20, 128  ;;  %p628_p12 = scmp.lt.s32.totalorder %s41_s20, %s41_s20 }
  0x1c   :  { %p624_p11 = scmp.ne.s32.totalorder %s41_s20, %s623_s29  ;;  %p629_p13 = scmp.lt.s32.totalorder %s623_s29, %s623_s29 }
  0x1e   :  { %p630_p0 = por %p629_p13, %p628_p12 }
  0x20   :  { %p631_p1 = pnand %p630_p0, %p624_p11 }
  0x22   :  { %634 = shalt.err (!%p631_p1)
}
  0x23   :  { %43 = dma.hbm_to_vmem [thread:$0]  %s925_s3, 128, %s41_s20, [#allocation6]  }
  0x24   :  { %679 = dma.done.wait [#allocation3], 1536  }
  0x25   :  { %680 = vsyncadd [#allocation3], 4294965760 }
  0x26   :  { %681 = dma.done.wait [#allocation6], 128  }
  0x27   :  { %682 = vsyncadd [#allocation6], 4294967168  ;;  %v691_v0 = vmov 1   ;;  %v692_v1 = vmov 0   ;;  %v56_v2 = vld [vmem:[%s922_s0] sm:$0xff]  ;;  %v57_v3 = vld [vmem:[%s922_s0 + $0x8] sm:$0xff]  ;;  %v84_v63 = vlaneseq }
  0x28   :  { %584 = vset.pattern.permute.xlu1 %v691_v0  ;;  %583 = vset.pattern.permute.xlu0 %v692_v1  ;;  %v58_v4 = vld [vmem:[%s922_s0 + $0x10] sm:$0xff]  ;;  %v59_v5 = vld [vmem:[%s922_s0 + $0x18] sm:$0xff]  ;;  %v359_v6 = vld [vmem:[%s928_s6] sm:$0xf]  ;;  %vm214_vm0 = vcmask 785408   ;;  %vm694_vm3 = vmmov 0  }
  0x29   :  { %100 = vperm.xlu1 %584, %v56_v2   ;;  %65 = vperm.xlu0 %583, %v56_v2   ;;  %v212_v7 = vld [vmem:[%s926_s4 + $0x20] sm:$0xff]  ;;  %v794_v10 = vld [vmem:[#allocation2 + $0x8] sm:$0xff]  ;;  %v800_v13 = vld [vmem:[#allocation2 + $0x10] sm:$0xff]  ;;  %vm365_vm4 = vcmask 64512   ;;  %s695_s9 = smov [#allocation7]  }
  0x2a   :  { %v208_v8 = vld [vmem:[%s926_s4] sm:$0xff]  ;;  %529 = vmatprep.mubr.msk.f32.mxu1 %vm214_vm0, %v212_v7  ;;  %v144_v12 = vmul.f32 %v794_v10, %v794_v10  ;;  %v145_v14 = vmul.f32 %v800_v13, %v800_v13  ;;  %v804_v16 = vld [vmem:[#allocation2 + $0x18] sm:$0xff]  ;;  %v808_v19 = vld [vmem:[#allocation2 + $0x30] sm:$0xff]  ;;  %s445_s10 = sshll.u32 %s695_s9, 4  ;;  %s446_s10 = int_to_ptr.vmem [resolvable:$true] %s445_s10 }
  0x2b   :  { %523 = vmatprep.mubr.msk.f32.mxu0 %vm214_vm0, %v208_v8  ;;  %v792_v9 = vld [vmem:[#allocation2] sm:$0xff]  ;;  %v146_v17 = vmul.f32 %v804_v16, %v804_v16  ;;  %v810_v20 = vld [vmem:[#allocation2 + $0x38] sm:$0xff]  ;;  %v176_v23 = vmul.f32 %v808_v19, %v808_v19  ;;  %v822_v29 = vld [vmem:[#allocation2 + $0x28] sm:$0xff]  ;;  %p640_p3 = scmp.lt.s32.totalorder %s446_s10, %s446_s10 }
  0x2c   :  { %v143_v11 = vmul.f32 %v792_v9, %v792_v9  ;;  %v334_v21 = vld [vmem:[#allocation5] sm:$0xff]  ;;  %v177_v24 = vmul.f32 %v810_v20, %v810_v20  ;;  %v148_v33 = vmul.f32 %v822_v29, %v822_v29  ;;  %v828_v35 = vld [vmem:[#allocation2 + $0x48] sm:$0xff]  ;;  %v832_v40 = vld [vmem:[#allocation2 + $0x50] sm:$0xff] }
  0x2d   :  { %104 = vperm.xlu1 %584, %v57_v3   ;;  %70 = vperm.xlu0 %583, %v57_v3   ;;  %v812_v22 = vld [vmem:[#allocation2 + $0x20] sm:$0xff]  ;;  %v335_v25 = vrot.slane %v334_v21, 4  ;;  %v179_v36 = vmul.f32 %v828_v35, %v828_v35  ;;  %v180_v41 = vmul.f32 %v832_v40, %v832_v40  ;;  %v836_v45 = vld [vmem:[#allocation2 + $0x58] sm:$0xff] }
  0x2e   :  { %v149_v15 = vadd.f32 %v144_v12, %v143_v11  ;;  %v147_v26 = vmul.f32 %v812_v22, %v812_v22  ;;  %v820_v28 = vld [vmem:[#allocation2 + $0x40] sm:$0xff]  ;;  %v182_v31 = vadd.f32 %v177_v24, %v176_v23  ;;  %v181_v46 = vmul.f32 %v836_v45, %v836_v45 }
  0x2f   :  { %v178_v30 = vmul.f32 %v820_v28, %v820_v28  ;;  %v336_v32 = vadd.f32 %v335_v25, %v334_v21  ;;  %v60_v2 = vld [vmem:[%s923_s1] sm:$0x1]  ;;  %v693_v12 = vmov 0.0  }
  0x30   :  { %v150_v18 = vadd.f32 %v149_v15, %v145_v14  ;;  %vm97_vm1 = vcmp.eq.s32.totalorder %v60_v2, 1  ;;  %vm61_vm2 = vcmp.eq.s32.totalorder %v60_v2, 0 }
  0x31   :  { %108 = vperm.xlu1 %584, %v58_v4   ;;  %75 = vperm.xlu0 %583, %v58_v4   ;;  %v183_v37 = vadd.f32 %v182_v31, %v178_v30  ;;  %v337_v38 = vrot.slane %v336_v32, 2  ;;  %v85_v4 = vshrl.u32 %v84_v63, 7  ;;  %v98_v14 = vsel %vm97_vm1, 1.0, %v693_v12 }
  0x32   :  { %v151_v27 = vadd.f32 %v150_v18, %v146_v17  ;;  %v62_v15 = vsel %vm61_vm2, 1.0, %v693_v12 }
  0x33   :  { %v184_v42 = vadd.f32 %v183_v37, %v179_v36  ;;  %v338_v43 = vadd.f32 %v337_v38, %v336_v32  ;;  %v86_v8 = vsub.s32 0, %v85_v4 }
  0x34   :  { %v152_v34 = vadd.f32 %v151_v27, %v147_v26 }
  0x35   :  { %112 = vperm.xlu1 %584, %v59_v5   ;;  %80 = vperm.xlu0 %583, %v59_v5   ;;  %v185_v47 = vadd.f32 %v184_v42, %v180_v41  ;;  %v339_v48 = vrot.slane %v338_v43, 1  ;;  %v849_v18 = vrot.slane %v98_v14, %v86_v8 }
  0x36   :  { %v153_v39 = vadd.f32 %v152_v34, %v148_v33 }
  0x37   :  { %v186_v50 = vadd.f32 %v185_v47, %v181_v46  ;;  %v340_v51 = vadd.f32 %v339_v48, %v338_v43 }
  0x38   :  { %v154_v44 = vrot.slane %v153_v39, 4 }
  0x39   :  { %362 = vperm.xlu0 %583, %v359_v6   ;;  %v187_v53 = vrot.slane %v186_v50, 4  ;;  %v342_v54 = vmul.f32 0.125, %v340_v51 }
  0x3a   :  { %v155_v49 = vadd.f32 %v154_v44, %v153_v39 }
  0x3b   :  { %v188_v56 = vadd.f32 %v187_v53, %v186_v50  ;;  %v840_v57 = vsub.f32 %v334_v21, %v342_v54  ;;  %v851_v21 = vrot.slane %v62_v15, %v86_v8 }
  0x3c   :  { %v156_v52 = vrot.slane %v155_v49, 2 }
  0x3d   :  { %v189_v59 = vrot.slane %v188_v56, 2  ;;  %v344_v60 = vmul.f32 %v840_v57, %v840_v57 }
  0x3e   :  { %v157_v55 = vadd.f32 %v156_v52, %v155_v49 }
  0x3f   :  { %v190_v62 = vadd.f32 %v189_v59, %v188_v56  ;;  %v345_v0 = vrot.slane %v344_v60, 4 }
  0x40   :  { %v158_v58 = vrot.slane %v157_v55, 1 }
  0x41   :  { %v191_v3 = vrot.slane %v190_v62, 1  ;;  %v346_v5 = vadd.f32 %v345_v0, %v344_v60 }
  0x42   :  { %v159_v61 = vadd.f32 %v158_v58, %v157_v55 }
  0x43   :  { %v192_v7 = vadd.f32 %v191_v3, %v190_v62  ;;  %v347_v11 = vrot.slane %v346_v5, 2 }
  0x44   :  { %v161_v1 = vmul.f32 0.0625, %v159_v61 }
  0x45   :  { %v193_v17 = vmul.f32 0.0625, %v192_v7  ;;  %v348_v23 = vadd.f32 %v347_v11, %v346_v5 }
  0x46   :  { %v162_v6 = vadd.f32 1e-05, %v161_v1 }
  0x47   :  { %v194_v26 = vadd.f32 1e-05, %v193_v17  ;;  %v349_v31 = vrot.slane %v348_v23, 1 }
  0x48   :  { %585 = vrsqrt.f32 %v162_v6 }
  0x49   :  { %587 = vrsqrt.f32 %v194_v26  ;;  %v350_v39 = vadd.f32 %v349_v31, %v348_v23  ;;  %v211_v31 = vld [vmem:[%s926_s4 + $0x18] sm:$0xff] }
  0x4b   :  { %v351_v48 = vmul.f32 0.125, %v350_v39 }
  0x4d   :  { %v352_v54 = vadd.f32 1e-05, %v351_v48 }
  0x4f   :  { %589 = vrsqrt.f32 %v352_v54 }
  0x52   :  { %v586_v32 = vpop.eup %585 }
  0x53   :  { %v164_v41 = vmul.f32 %v586_v32, %v792_v9  ;;  %v165_v44 = vmul.f32 %v586_v32, %v794_v10  ;;  %v167_v46 = vmul.f32 %v586_v32, %v804_v16  ;;  %v166_v49 = vmul.f32 %v586_v32, %v800_v13  ;;  %v588_v58 = vpop.eup %587 }
  0x54   :  { %v169_v53 = vmul.f32 %v586_v32, %v822_v29  ;;  %v168_v9 = vmul.f32 %v586_v32, %v812_v22  ;;  %v197_v16 = vmul.f32 %v588_v58, %v810_v20  ;;  %v196_v29 = vmul.f32 %v588_v58, %v808_v19 }
  0x55   :  { %v199_v22 = vmul.f32 %v588_v58, %v828_v35  ;;  %v198_v20 = vmul.f32 %v588_v58, %v820_v28  ;;  %v201_v19 = vmul.f32 %v588_v58, %v836_v45  ;;  %v200_v5 = vmul.f32 %v588_v58, %v832_v40 }
  0x59   :  { %v590_v7 = vpop.eup %589 }
  0x5a   :  { %v354_v45 = vmul.f32 %v590_v7, %v840_v57  ;;  %v209_v57 = vld [vmem:[%s926_s4 + $0x8] sm:$0xff] }
  0xa8   :  { %v101_v24 = vpop.permute.xlu1 %100  ;;  %v66_v25 = vpop.permute.xlu0 %65 }
  0xa9   :  { %v121_v27 = vmul.f32 %v849_v18, %v101_v24  ;;  %v89_v30 = vmul.f32 %v851_v21, %v66_v25 }
  0xab   :  { %v125_v33 = vadd.f32 %v121_v27, %v89_v30  ;;  %v213_v27 = vld [vmem:[%s926_s4 + $0x28] sm:$0xff]  ;;  %v358_v30 = vld [vmem:[%s927_s5] sm:$0xf]  ;;  %s696_s5 = smov [#allocation8]  }
  0xac   :  { %v105_v34 = vpop.permute.xlu1 %104  ;;  %v71_v36 = vpop.permute.xlu0 %70  ;;  %s458_s11 = sshll.u32 %s696_s5, 4  ;;  %s459_s11 = int_to_ptr.vmem [resolvable:$true] %s458_s11 }
  0xad   :  { %v122_v37 = vmul.f32 %v849_v18, %v105_v34  ;;  %v90_v38 = vmul.f32 %v851_v21, %v71_v36  ;;  %v141_v42 = vadd.f32 1.0, %v125_v33 }
  0xaf   :  { %v126_v43 = vadd.f32 %v122_v37, %v90_v38  ;;  %v170_v50 = vmul.f32 %v164_v41, %v141_v42  ;;  %v172_v56 = vmul.f32 %v166_v49, %v141_v42  ;;  %v174_v13 = vmul.f32 %v168_v9, %v141_v42 }
  0xb0   :  { %v109_v60 = vpop.permute.xlu1 %108  ;;  %v76_v61 = vpop.permute.xlu0 %75  ;;  %v202_v0 = vmul.f32 %v196_v29, %v141_v42  ;;  %v204_v35 = vmul.f32 %v198_v20, %v141_v42  ;;  %v206_v15 = vmul.f32 %v200_v5, %v141_v42 }
  0xb1   :  { %v142_v47 = vadd.f32 1.0, %v126_v43  ;;  %v123_v1 = vmul.f32 %v849_v18, %v109_v60  ;;  %v91_v2 = vmul.f32 %v851_v21, %v76_v61 }
  0xb3   :  { %v171_v51 = vmul.f32 %v165_v44, %v142_v47  ;;  %v173_v52 = vmul.f32 %v167_v46, %v142_v47  ;;  %v175_v59 = vmul.f32 %v169_v53, %v142_v47  ;;  %v203_v63 = vmul.f32 %v197_v16, %v142_v47 }
  0xb4   :  { %v205_v4 = vmul.f32 %v199_v22, %v142_v47  ;;  %v127_v6 = vadd.f32 %v123_v1, %v91_v2  ;;  %v113_v8 = vpop.permute.xlu1 %112  ;;  %v81_v11 = vpop.permute.xlu0 %80  ;;  %v207_v14 = vmul.f32 %v201_v19, %v142_v47 }
  0xb5   :  { %v537_v55 = vpack.c.bf16 %v171_v51, %v170_v50  ;;  %v541_v10 = vpack.c.bf16 %v173_v52, %v172_v56  ;;  %v545_v62 = vpack.c.bf16 %v175_v59, %v174_v13  ;;  %v549_v3 = vpack.c.bf16 %v203_v63, %v202_v0 }
  0xb6   :  { %v553_v28 = vpack.c.bf16 %v205_v4, %v204_v35  ;;  %v355_v17 = vadd.f32 1.0, %v127_v6  ;;  %v124_v23 = vmul.f32 %v849_v18, %v113_v8  ;;  %v92_v24 = vmul.f32 %v851_v21, %v81_v11  ;;  %v210_v21 = vld [vmem:[%s926_s4 + $0x10] sm:$0xff]  ;;  %s635_s4 = scalar_lea.vmem %s446_s10, 768 }
  0xb7   :  { %538 = vmatprep.subr.bf16.mxu0 %v537_v55  ;;  %561 = vmatprep.subr.bf16.mxu1 %v537_v55  ;;  %v557_v25 = vpack.c.bf16 %v207_v14, %v206_v15  ;;  %p636_p2 = scmp.ne.s32.totalorder %s446_s10, %s635_s4  ;;  %p641_p4 = scmp.lt.s32.totalorder %s635_s4, %s635_s4 }
  0xb8   :  { %540 = vmatpush3.bf16.msra.mxu0 %v537_v55  ;;  %567 = vmatpush3.bf16.msra.mxu1 %v537_v55  ;;  %v356_v40 = vmul.f32 %v355_v17, %v354_v45  ;;  %v128_v26 = vadd.f32 %v124_v23, %v92_v24  ;;  %v363_v36 = vpop.permute.xlu0 %362 }
  0xb9   :  { %542 = vmatprep.subr.bf16.mxu0 %v541_v10  ;;  %562 = vmatprep.subr.bf16.mxu1 %v541_v10  ;;  %p642_p5 = por %p641_p4, %p640_p3 }
  0xba   :  { %v357_v18 = vadd.f32 %v356_v40, %v128_v26 }
  0xbb   :  { %p643_p6 = pnand %p642_p5, %p636_p2 }
  0xbc   :  { %544 = vmatpush3.bf16.msra.mxu0 %v541_v10  ;;  %568 = vmatpush3.bf16.msra.mxu1 %v541_v10 }
  0xbd   :  { %546 = vmatprep.subr.bf16.mxu0 %v545_v62  ;;  %563 = vmatprep.subr.bf16.mxu1 %v545_v62 }
  0xc0   :  { %548 = vmatpush3.bf16.msra.mxu0 %v545_v62  ;;  %569 = vmatpush3.bf16.msra.mxu1 %v545_v62 }
  0xc1   :  { %550 = vmatprep.subr.bf16.mxu0 %v549_v3  ;;  %564 = vmatprep.subr.bf16.mxu1 %v549_v3 }
  0xc4   :  { %552 = vmatpush3.bf16.msra.mxu0 %v549_v3  ;;  %570 = vmatpush3.bf16.msra.mxu1 %v549_v3 }
  0xc5   :  { %554 = vmatprep.subr.bf16.mxu0 %v553_v28  ;;  %565 = vmatprep.subr.bf16.mxu1 %v553_v28 }
  0xc8   :  { %556 = vmatpush3.bf16.msra.mxu0 %v553_v28  ;;  %571 = vmatpush3.bf16.msra.mxu1 %v553_v28 }
  0xc9   :  { %558 = vmatprep.subr.bf16.mxu0 %v557_v25  ;;  %566 = vmatprep.subr.bf16.mxu1 %v557_v25 }
  0xcc   :  { %560 = vmatpush3.bf16.msra.mxu0 %v557_v25  ;;  %572 = vmatpush3.bf16.msra.mxu1 %v557_v25 }
  0xcd   :  { %532 = vmatprep.subr.mxu1 %v693_v12 }
  0xcf   :  { %530 = vmatmul.mubr.msk.f32.vlgmr.msra.gmra.mrb[0].mxu1 %vm214_vm0, %v213_v27  ;;  %524 = vmatmul.mubr.msk.f32.vlgmr.msra.gmra.mrb[0].mxu0 %vm214_vm0, %v209_v57 }
  0xd0   :  { %533 = vmatpush3.msra.mxu1 %v357_v18  ;;  %534 = vmatprep.mubr.msk.f32.mxu1 %vm694_vm3, %v693_v12 }
  0xd1   :  { %526 = vmatprep.mubr.msk.f32.mxu0 %vm214_vm0, %v210_v21 }
  0xd3   :  { %535 = vmatmul.mubr.msk.f32.vlgmr.msra.gmra.mrb[2].mxu1 %vm365_vm4, %v358_v30  ;;  %527 = vmatmul.mubr.msk.f32.gmra.mrb[2].mxu0 %vm214_vm0, %v211_v31 }
 0x1a2   :  { %v531_v32 = vpop.f32.mrb[0].mxu1  ;;  %v525_v33 = vpop.f32.mrb[0].mxu0 }
 0x1a3   :  { %333 = vst [vmem:[#allocation7 + $0x28] sm:$0xff] %v531_v32  ;;  %329 = vst [vmem:[#allocation7 + $0x8] sm:$0xff] %v525_v33  ;;  %v319_v34 = vpop.f32.mrb[1].mxu1  ;;  %v299_v12 = vpop.f32.mrb[1].mxu0 }
 0x1a4   :  { %332 = vst [vmem:[#allocation7 + $0x20] sm:$0xff] %v319_v34  ;;  %328 = vst [vmem:[#allocation7] sm:$0xff] %v299_v12 }
 0x1a6   :  { %v435_v37 = vpop.f32.mrb[2].mxu1  ;;  %v528_v38 = vpop.f32.mrb[2].mxu0 }
 0x1a7   :  { %v436_v39 = vadd.f32 %v435_v37, %v363_v36  ;;  %331 = vst [vmem:[#allocation7 + $0x18] sm:$0xff] %v528_v38  ;;  %v536_v41 = vpop.f32.mrb[3].mxu1  ;;  %v309_v42 = vpop.f32.mrb[3].mxu0 }
 0x1a8   :  { %330 = vst [vmem:[#allocation7 + $0x10] sm:$0xff] %v309_v42 }
 0x1a9   :  { %439 = vst [vmem:[#allocation8] sm:$0xf] %v436_v39 }
 0x1aa   :  { %646 = shalt.err (!%p643_p6)
}
 0x1ab   :  { %s647_s13 = scalar_lea.hbm %s929_s7, 768 }
 0x1ac   :  { %p648_p7 = scmp.ne.s32.totalorder %s929_s7, %s647_s13  ;;  %p651_p8 = scmp.lt.u32.totalorder %s647_s13, %s929_s7 }
 0x1ae   :  { %p653_p9 = pnand %p651_p8, %p648_p7 }
 0x1b0   :  { %656 = shalt.err (!%p653_p9)
}
 0x1b1   :  { %451 = dma.vmem_to_hbm [thread:$0]  %s446_s10, 768, %s929_s7, [#allocation4], %s688_s15, %s688_s15, %s689_s16  }
 0x1b2   :  { %s657_s22 = scalar_lea.vmem %s459_s11, 64  ;;  %p662_p11 = scmp.lt.s32.totalorder %s459_s11, %s459_s11 }
 0x1b3   :  { %p658_p10 = scmp.ne.s32.totalorder %s459_s11, %s657_s22  ;;  %p663_p12 = scmp.lt.s32.totalorder %s657_s22, %s657_s22 }
 0x1b5   :  { %p664_p13 = por %p663_p12, %p662_p11 }
 0x1b7   :  { %p665_p0 = pnand %p664_p13, %p658_p10 }
 0x1b9   :  { %668 = shalt.err (!%p665_p0)
}
 0x1ba   :  { %s669_s1 = scalar_lea.hbm %s930_s8, 64 }
 0x1bb   :  { %p670_p1 = scmp.ne.s32.totalorder %s930_s8, %s669_s1  ;;  %p673_p2 = scmp.lt.u32.totalorder %s669_s1, %s930_s8 }
 0x1bd   :  { %p675_p3 = pnand %p673_p2, %p670_p1 }
 0x1bf   :  { %678 = shalt.err (!%p675_p3)
}
 0x1c0   :  { %461 = dma.vmem_to_hbm [thread:$0]  %s459_s11, 64, %s930_s8, [#allocation9]  }
 0x1c1   :  { %683 = dma.done.wait [#allocation4], 768  }
 0x1c2   :  { %684 = vsyncadd [#allocation4], 4294966528 }
 0x1c3   :  { %685 = dma.done.wait [#allocation9], 64  }
 0x1c4   :  { %686 = vsyncadd [#allocation9], 4294967232 }
 0x1c5   :  { %468 = vsyncpa [#allocation3], 1 }
 0x1c6   :  { %469 = vsyncpa [#allocation6], 1 }
 0x1c7   :  { %470 = vsyncpa [#allocation4], 1 }
 0x1c8   :  { %471 = vsyncpa [#allocation9], 1 }

</bundles_post_ra>
